<compile_context>
chip_gen: v7x
topology: tpu7x:2x2x1
jax: 0.10.0
libtpu: 0.0.40
codegen_flags: <defaults>
</compile_context>

<pallas_src>
import functools
import math

import jax
import jax.numpy as jnp
import numpy as np
from jax.experimental import pallas as pl
from jax.experimental.pallas import tpu as pltpu

_LANE = 128
_EPS = 1e-5
_LEAKY_SLOPE = 0.01


# ---------------------------------------------------------------------------
# Static (trace-time) helpers: tiling, tap masks, BN folding, weight re-wiring
# ---------------------------------------------------------------------------
def _lcm(a, b):
    return a * b // math.gcd(a, b)


def _images_per_tile(sp, n):
    """Images per lane-tile: keeps tiles lane-aligned (multiple of 128) and
    keeps >=2 grid steps when the batch allows (dual-TC sharding / overlap)."""
    ipt = _lcm(sp, _LANE) // sp
    while ipt * sp < 512 and (n // (ipt * 2)) >= 2:
        ipt *= 2
    return ipt


def _tap_masks_3x3(hh, ww, ipt):
    """(9, 1, T) f32 validity masks for the 9 taps of a stride-1 3x3 conv
    (padding=1) on `ipt` images of (hh, ww) concatenated along lanes."""
    sp = hh * ww
    l = np.arange(ipt * sp) % sp
    h = l // ww
    w = l % ww
    masks = []
    for ky in range(3):
        for kx in range(3):
            dy, dx = ky - 1, kx - 1
            masks.append((h + dy >= 0) & (h + dy < hh)
                         & (w + dx >= 0) & (w + dx < ww))
    return np.stack(masks).astype(np.float32)[:, None, :]


def _offset_masks_s2(ho, wo, ipt):
    """(4, 1, T) masks for the 4 lattice offsets of a stride-2 3x3 conv
    (padding=1) expressed on the space-to-depth output grid (H, W even)."""
    sp = ho * wo
    l = np.arange(ipt * sp) % sp
    hq = l // wo
    wq = l % wo
    masks = []
    for dy in (-1, 0):
        for dx in (-1, 0):
            masks.append((hq + dy >= 0) & (wq + dx >= 0))
    return np.stack(masks).astype(np.float32)[:, None, :]


def _fold_bn_into_conv(w, b, bn):
    """Fold inference-mode BN into conv: scale -> weights, rest -> bias."""
    scale = bn["gamma"] * jax.lax.rsqrt(bn["var"] + _EPS)
    wf = (w * scale[:, None, None, None]).astype(jnp.float32)
    bf = ((b - bn["mean"]) * scale + bn["beta"]).astype(jnp.float32)
    return wf, bf


def _taps_3x3(wf):
    """(Co, Ci, 3, 3) -> (9, Co, Ci), tap index t = ky*3 + kx."""
    co, ci = wf.shape[0], wf.shape[1]
    return wf.transpose(2, 3, 0, 1).reshape(9, co, ci)


def _offset_weights_s2(wf):
    """(Co, Ci, 3, 3) -> (4, Co, 4*Ci): phase-wired weights for the 4 lattice
    offsets (Dy, Dx) in {-1,0}^2 of a stride-2 3x3 conv on the space-to-depth
    (phase-major: channel = (py*2+px)*Ci + c) layout."""
    co, ci = wf.shape[0], wf.shape[1]
    blocks = []
    for dy in (-1, 0):
        for dx in (-1, 0):
            cols = []
            for py in range(2):
                for px in range(2):
                    ky, kx = 2 * dy + py + 1, 2 * dx + px + 1
                    if 0 <= ky <= 2 and 0 <= kx <= 2:
                        cols.append(wf[:, :, ky, kx])
                    else:
                        cols.append(jnp.zeros((co, ci), jnp.float32))
            blocks.append(jnp.concatenate(cols, axis=1))
    return jnp.stack(blocks)


# ---------------------------------------------------------------------------
# In-kernel building blocks
# ---------------------------------------------------------------------------
def _shift_cols(v, off):
    """result[:, l] = v[:, (l + off) % T]; wrapped columns are always masked."""
    if off == 0:
        return v
    return pltpu.roll(v, (-off) % v.shape[1], 1)


def _conv3x3_acc(xt, w_ref, m_ref, ww):
    """sum_t  W_t @ (shift(xt, dy*ww+dx) * mask_t)  over the 9 taps."""
    acc = None
    for ky in range(3):
        for kx in range(3):
            t = ky * 3 + kx
            off = (ky - 1) * ww + (kx - 1)
            v = _shift_cols(xt, off) * m_ref[t]
            c = jnp.dot(w_ref[t], v, preferred_element_type=jnp.float32)
            acc = c if acc is None else acc + c
    return acc


def _sa_att_kernel(x_ref, w1_ref, b1_ref, w2_ref, b2_ref, m_ref, att_ref, *, ww):
    # Whole SA branch fused: conv3x3+BN+ReLU -> conv1x1+BN -> sigmoid.
    xt = x_ref[...].astype(jnp.float32)
    t = _conv3x3_acc(xt, w1_ref, m_ref, ww) + b1_ref[...]
    t = jnp.maximum(t, 0.0)
    att = jax.nn.sigmoid(
        jnp.dot(w2_ref[...], t, preferred_element_type=jnp.float32) + b2_ref[...])
    att_ref[...] = att.astype(att_ref.dtype)


def _conv1_s1_kernel(x_ref, att_ref, w_ref, b_ref, m_ref, h_ref, *, ww):
    # sa = x*att fused in; conv3x3(stride1) + BN1 + LeakyReLU.
    sa = x_ref[...].astype(jnp.float32) * att_ref[...].astype(jnp.float32)
    acc = _conv3x3_acc(sa, w_ref, m_ref, ww) + b_ref[...]
    h_ref[...] = jnp.maximum(acc, _LEAKY_SLOPE * acc).astype(h_ref.dtype)


def _conv1_s2_kernel(xd_ref, attd_ref, w_ref, b_ref, m_ref, h_ref, *, wo):
    # Stride-2 conv as 4 lattice-offset matmuls on the space-to-depth layout.
    sad = xd_ref[...].astype(jnp.float32) * attd_ref[...].astype(jnp.float32)
    acc = None
    i = 0
    for dy in (-1, 0):
        for dx in (-1, 0):
            v = _shift_cols(sad, dy * wo + dx) * m_ref[i]
            c = jnp.dot(w_ref[i], v, preferred_element_type=jnp.float32)
            acc = c if acc is None else acc + c
            i += 1
    acc = acc + b_ref[...]
    h_ref[...] = jnp.maximum(acc, _LEAKY_SLOPE * acc).astype(h_ref.dtype)


def _make_conv2_kernel(ww, c_in, proj):
    # conv3x3 + BN2 + residual (identity or folded 1x1-conv) + final LeakyReLU.
    if proj:
        def kernel(h_ref, xs_ref, w_ref, b_ref, wsc_ref, bsc_ref, m_ref, o_ref):
            ht = h_ref[...].astype(jnp.float32)
            acc = _conv3x3_acc(ht, w_ref, m_ref, ww) + b_ref[...]
            xs = xs_ref[...][:c_in, :].astype(jnp.float32)   # phase-(0,0) rows
            acc = acc + jnp.dot(wsc_ref[...], xs,
                                preferred_element_type=jnp.float32) + bsc_ref[...]
            o_ref[...] = jnp.maximum(acc, _LEAKY_SLOPE * acc).astype(o_ref.dtype)
    else:
        def kernel(h_ref, x_ref, w_ref, b_ref, m_ref, o_ref):
            ht = h_ref[...].astype(jnp.float32)
            acc = _conv3x3_acc(ht, w_ref, m_ref, ww) + b_ref[...]
            acc = acc + x_ref[...].astype(jnp.float32)
            o_ref[...] = jnp.maximum(acc, _LEAKY_SLOPE * acc).astype(o_ref.dtype)
    return kernel


# ---------------------------------------------------------------------------
# pallas_call wrappers
# ---------------------------------------------------------------------------
def _parallel():
    return pltpu.CompilerParams(dimension_semantics=("parallel",))


def _sa_attention(x_cm, w1_taps, b1, w2, b2, hh, ww, ipt):
    c, m = x_cm.shape
    tile = ipt * hh * ww
    masks = jnp.asarray(_tap_masks_3x3(hh, ww, ipt))
    return pl.pallas_call(
        functools.partial(_sa_att_kernel, ww=ww),
        out_shape=jax.ShapeDtypeStruct((1, m), jnp.bfloat16),
        grid=(m // tile,),
        in_specs=[
            pl.BlockSpec((c, tile), lambda i: (0, i)),
            pl.BlockSpec(w1_taps.shape, lambda i: (0, 0, 0)),
            pl.BlockSpec(b1.shape, lambda i: (0, 0)),
            pl.BlockSpec(w2.shape, lambda i: (0, 0)),
            pl.BlockSpec(b2.shape, lambda i: (0, 0)),
            pl.BlockSpec(masks.shape, lambda i: (0, 0, 0)),
        ],
        out_specs=pl.BlockSpec((1, tile), lambda i: (0, i)),
        compiler_params=_parallel(),
    )(x_cm, w1_taps, b1, w2, b2, masks)


def _conv1_stride1(x_cm, att, w_taps, b, hh, ww, ipt):
    c, m = x_cm.shape
    co = w_taps.shape[1]
    tile = ipt * hh * ww
    masks = jnp.asarray(_tap_masks_3x3(hh, ww, ipt))
    return pl.pallas_call(
        functools.partial(_conv1_s1_kernel, ww=ww),
        out_shape=jax.ShapeDtypeStruct((co, m), jnp.bfloat16),
        grid=(m // tile,),
        in_specs=[
            pl.BlockSpec((c, tile), lambda i: (0, i)),
            pl.BlockSpec((1, tile), lambda i: (0, i)),
            pl.BlockSpec(w_taps.shape, lambda i: (0, 0, 0)),
            pl.BlockSpec(b.shape, lambda i: (0, 0)),
            pl.BlockSpec(masks.shape, lambda i: (0, 0, 0)),
        ],
        out_specs=pl.BlockSpec((co, tile), lambda i: (0, i)),
        compiler_params=_parallel(),
    )(x_cm, att, w_taps, b, masks)


def _conv1_stride2(xd_cm, attd_exp, w4, b, ho, wo, ipt):
    c4, mo = xd_cm.shape
    co = w4.shape[1]
    tile = ipt * ho * wo
    masks = jnp.asarray(_offset_masks_s2(ho, wo, ipt))
    return pl.pallas_call(
        functools.partial(_conv1_s2_kernel, wo=wo),
        out_shape=jax.ShapeDtypeStruct((co, mo), jnp.bfloat16),
        grid=(mo // tile,),
        in_specs=[
            pl.BlockSpec((c4, tile), lambda i: (0, i)),
            pl.BlockSpec((c4, tile), lambda i: (0, i)),
            pl.BlockSpec(w4.shape, lambda i: (0, 0, 0)),
            pl.BlockSpec(b.shape, lambda i: (0, 0)),
            pl.BlockSpec(masks.shape, lambda i: (0, 0, 0)),
        ],
        out_specs=pl.BlockSpec((co, tile), lambda i: (0, i)),
        compiler_params=_parallel(),
    )(xd_cm, attd_exp, w4, b, masks)


def _conv2_residual(h1, res_src, w_taps, b, hh, ww, ipt, c_in, wsc=None, bsc=None):
    co, mo = h1.shape
    cr = res_src.shape[0]
    tile = ipt * hh * ww
    masks = jnp.asarray(_tap_masks_3x3(hh, ww, ipt))
    proj = wsc is not None
    in_specs = [
        pl.BlockSpec((co, tile), lambda i: (0, i)),
        pl.BlockSpec((cr, tile), lambda i: (0, i)),
        pl.BlockSpec(w_taps.shape, lambda i: (0, 0, 0)),
        pl.BlockSpec(b.shape, lambda i: (0, 0)),
    ]
    args = [h1, res_src, w_taps, b]
    if proj:
        in_specs += [pl.BlockSpec(wsc.shape, lambda i: (0, 0)),
                     pl.BlockSpec(bsc.shape, lambda i: (0, 0))]
        args += [wsc, bsc]
    in_specs.append(pl.BlockSpec(masks.shape, lambda i: (0, 0, 0)))
    args.append(masks)
    return pl.pallas_call(
        _make_conv2_kernel(ww, c_in, proj),
        out_shape=jax.ShapeDtypeStruct((co, mo), jnp.float32),
        grid=(mo // tile,),
        in_specs=in_specs,
        out_specs=pl.BlockSpec((co, tile), lambda i: (0, i)),
        compiler_params=_parallel(),
    )(*args)


# ---------------------------------------------------------------------------
# ResBlock_SA forward (Pallas)
# ---------------------------------------------------------------------------
def resblock_sa_forward(x, params, stride=1):
    # BatchNorm is applied in inference mode (folded running statistics).
    # TODO(synk): training-mode batch statistics / running-stat updates are not
    # implemented.
    assert stride in (1, 2), "only stride 1 or 2 is supported"
    n, c_in, h, w = x.shape
    c_out = params["w1"].shape[0]
    hw = h * w
    if stride == 2:
        assert h % 2 == 0 and w % 2 == 0, "stride-2 path requires even H, W"
        ho, wo = h // 2, w // 2
    else:
        ho, wo = h, w
    sp_out = ho * wo

    # Lane-tile sizing (whole images per grid step) + batch padding so every
    # kernel's lane extent divides evenly into lane-aligned tiles.
    ipt_in = _images_per_tile(hw, n)
    ipt_out = _images_per_tile(sp_out, n)
    step = _lcm(ipt_in, ipt_out)
    n_pad = -(-n // step) * step
    xb = x if n_pad == n else jnp.pad(x, ((0, n_pad - n), (0, 0), (0, 0), (0, 0)))

    # Channel-major, lane-dense layout; bf16 storage for the streamed operands.
    x_cm = xb.transpose(1, 0, 2, 3).reshape(c_in, n_pad * hw).astype(jnp.bfloat16)

    # Fold BN into the conv weights/biases (tiny trace-time work only).
    wa1, ba1 = _fold_bn_into_conv(params["sa_w1"], params["sa_b1"], params["sa_bn1"])
    wa2, ba2 = _fold_bn_into_conv(params["sa_w2"], params["sa_b2"], params["sa_bn2"])
    w1f, b1f = _fold_bn_into_conv(params["w1"], params["b1"], params["bn1"])
    w2f, b2f = _fold_bn_into_conv(params["w2"], params["b2"], params["bn2"])

    # ---- SA branch: ONE fused kernel -> spatial attention row (1, M) ----
    att = _sa_attention(x_cm, _taps_3x3(wa1), ba1.reshape(-1, 1),
                        wa2[:, :, 0, 0], ba2.reshape(1, 1), h, w, ipt_in)

    # ---- conv1 (with x*att fused) + BN1 + LeakyReLU ----
    if stride == 1:
        h1 = _conv1_stride1(x_cm, att, _taps_3x3(w1f), b1f.reshape(-1, 1),
                            h, w, ipt_in)
        res_src = x_cm
    else:
        # space-to-depth (phase-major) layouts: strided conv -> 4 offset matmuls
        xd_cm = (xb.reshape(n_pad, c_in, ho, 2, wo, 2)
                 .transpose(3, 5, 1, 0, 2, 4)
                 .reshape(4 * c_in, n_pad * sp_out).astype(jnp.bfloat16))
        attd = (att.reshape(n_pad, ho, 2, wo, 2)
                .transpose(2, 4, 0, 1, 3)
                .reshape(4, n_pad * sp_out))
        attd_exp = jnp.repeat(attd, c_in, axis=0)            # match xd rows
        h1 = _conv1_stride2(xd_cm, attd_exp, _offset_weights_s2(w1f),
                            b1f.reshape(-1, 1), ho, wo, ipt_out)
        res_src = xd_cm   # phase-(0,0) rows == x[:, :, ::2, ::2] (1x1 stride-2)

    # ---- conv2 + BN2 + residual + final LeakyReLU: ONE fused kernel ----
    if stride != 1 or c_out != c_in:
        wsc, bsc = _fold_bn_into_conv(params["w_sc"], params["b_sc"], params["bn_sc"])
        out_cm = _conv2_residual(h1, res_src, _taps_3x3(w2f), b2f.reshape(-1, 1),
                                 ho, wo, ipt_out, c_in,
                                 wsc=wsc[:, :, 0, 0], bsc=bsc.reshape(-1, 1))
    else:
        out_cm = _conv2_residual(h1, res_src, _taps_3x3(w2f), b2f.reshape(-1, 1),
                                 ho, wo, ipt_out, c_in)

    out = out_cm.reshape(c_out, n_pad, ho, wo).transpose(1, 0, 2, 3)
    return out[:n]


# ---------------------------------------------------------------------------
# Pure-JAX reference (correctness check only)
# ---------------------------------------------------------------------------
def _ref_bn(x, bn):
    g = bn["gamma"][None, :, None, None]
    bt = bn["beta"][None, :, None, None]
    mu = bn["mean"][None, :, None, None]
    vr = bn["var"][None, :, None, None]
    return (x - mu) / jnp.sqrt(vr + _EPS) * g + bt


def _ref_conv(x, w, b, stride, padding):
    y = jax.lax.conv_general_dilated(
        x, w, window_strides=(stride, stride),
        padding=[(padding, padding), (padding, padding)],
        dimension_numbers=("NCHW", "OIHW", "NCHW"))
    return y + b[None, :, None, None]


def resblock_sa_reference(x, params, stride=1):
    t = jnp.maximum(_ref_bn(_ref_conv(x, params["sa_w1"], params["sa_b1"], 1, 1),
                            params["sa_bn1"]), 0.0)
    att = jax.nn.sigmoid(_ref_bn(_ref_conv(t, params["sa_w2"], params["sa_b2"], 1, 0),
                                 params["sa_bn2"]))
    sa = x * att
    h = _ref_bn(_ref_conv(sa, params["w1"], params["b1"], stride, 1), params["bn1"])
    h = jnp.where(h >= 0.0, h, _LEAKY_SLOPE * h)
    h = _ref_bn(_ref_conv(h, params["w2"], params["b2"], 1, 1), params["bn2"])
    c_in, c_out = x.shape[1], params["w1"].shape[0]
    if stride != 1 or c_out != c_in:
        r = _ref_bn(_ref_conv(x, params["w_sc"], params["b_sc"], stride, 0),
                    params["bn_sc"])
    else:
        r = x
    out = h + r
    return jnp.where(out >= 0.0, out, _LEAKY_SLOPE * out)


# ---------------------------------------------------------------------------
# Parameter init (matches module init; BN running stats randomized so that the
# inference-mode BN is non-trivial in the check)
# ---------------------------------------------------------------------------
def init_params(key, c_in, c_out, stride):
    keys = jax.random.split(key, 10)

    def conv_w(k, co, ci, ks):
        return 0.02 * jax.random.normal(k, (co, ci, ks, ks), jnp.float32)

    def bn_stats(k, c):
        k1, k2 = jax.random.split(k)
        return dict(gamma=jnp.ones((c,), jnp.float32),
                    beta=jnp.zeros((c,), jnp.float32),
                    mean=0.1 * jax.random.normal(k1, (c,), jnp.float32),
                    var=jax.random.uniform(k2, (c,), jnp.float32, 0.5, 1.5))

    p = dict(
        sa_w1=conv_w(keys[0], c_in, c_in, 3), sa_b1=jnp.zeros((c_in,), jnp.float32),
        sa_bn1=bn_stats(keys[1], c_in),
        sa_w2=conv_w(keys[2], 1, c_in, 1), sa_b2=jnp.zeros((1,), jnp.float32),
        sa_bn2=bn_stats(keys[3], 1),
        w1=conv_w(keys[4], c_out, c_in, 3), b1=jnp.zeros((c_out,), jnp.float32),
        bn1=bn_stats(keys[5], c_out),
        w2=conv_w(keys[6], c_out, c_out, 3), b2=jnp.zeros((c_out,), jnp.float32),
        bn2=bn_stats(keys[7], c_out),
    )
    if stride != 1 or c_out != c_in:
        p.update(
            w_sc=conv_w(keys[8], c_out, c_in, 1),
            b_sc=jnp.zeros((c_out,), jnp.float32),
            bn_sc=bn_stats(keys[9], c_out),
        )
    return p


if __name__ == "__main__":
    key = jax.random.PRNGKey(0)
    kx_, kpa, kpb = jax.random.split(key, 3)
    x = jax.random.normal(kx_, (2, 4, 16, 16), dtype=jnp.float32)

    # bf16 storage of the streamed operands -> slightly looser tolerance.
    ATOL = RTOL = 2e-2

    # Config A: stride=1, out_channels == in_channels -> identity shortcut.
    params_a = init_params(kpa, 4, 4, stride=1)
    out_a = jax.block_until_ready(resblock_sa_forward(x, params_a, stride=1))
    ref_a = resblock_sa_reference(x, params_a, stride=1)
    assert out_a.shape == (2, 4, 16, 16)
    assert jnp.allclose(out_a, ref_a, atol=ATOL, rtol=RTOL), \
        float(jnp.max(jnp.abs(out_a - ref_a)))

    # Config B: stride=2, out_channels != in_channels -> 1x1-conv+BN shortcut.
    params_b = init_params(kpb, 4, 8, stride=2)
    out_b = jax.block_until_ready(resblock_sa_forward(x, params_b, stride=2))
    ref_b = resblock_sa_reference(x, params_b, stride=2)
    assert out_b.shape == (2, 8, 8, 8)
    assert jnp.allclose(out_b, ref_b, atol=ATOL, rtol=RTOL), \
        float(jnp.max(jnp.abs(out_b - ref_b)))

    print("KERNEL_OK")
</pallas_src>

<mosaic_0001>
module attributes {stable_mosaic.version = 11 : i64} {
  func.func @_sa_att_kernel(%arg0: i32, %arg1: memref<4x256xbf16, #tpu.memory_space<vmem>>, %arg2: memref<9x4x4xf32, #tpu.memory_space<vmem>>, %arg3: memref<4x1xf32, #tpu.memory_space<vmem>>, %arg4: memref<1x4xf32, #tpu.memory_space<vmem>>, %arg5: memref<1x1xf32, #tpu.memory_space<vmem>>, %arg6: memref<9x1x256xf32, #tpu.memory_space<vmem>>, %arg7: memref<1x256xbf16, #tpu.memory_space<vmem>>) attributes {dimension_semantics = [#tpu.dimension_semantics<parallel>], iteration_bounds = array<i64: 2>, scalar_prefetch = 0 : i64, scratch_operands = 0 : i64, tpu.core_type = #tpu.core_type<tc>, window_params = [{transform_indices = @transform_0, window_bounds = array<i64: 4, 256>}, {pipeline_mode = #tpu.pipeline_mode<synchronous>, transform_indices = @transform_1, window_bounds = array<i64: 9, 4, 4>}, {pipeline_mode = #tpu.pipeline_mode<synchronous>, transform_indices = @transform_2, window_bounds = array<i64: 4, 1>}, {pipeline_mode = #tpu.pipeline_mode<synchronous>, transform_indices = @transform_3, window_bounds = array<i64: 1, 4>}, {pipeline_mode = #tpu.pipeline_mode<synchronous>, transform_indices = @transform_4, window_bounds = array<i64: 1, 1>}, {pipeline_mode = #tpu.pipeline_mode<synchronous>, transform_indices = @transform_5, window_bounds = array<i64: 9, 1, 256>}, {transform_indices = @transform_6, window_bounds = array<i64: 1, 256>}]} {
    %c0 = arith.constant 0 : index
    %c0_0 = arith.constant 0 : index
    %0 = vector.load %arg1[%c0, %c0_0] : memref<4x256xbf16, #tpu.memory_space<vmem>>, vector<4x256xbf16>
    %1 = arith.extf %0 : vector<4x256xbf16> to vector<4x256xf32>
    %c17_i32 = arith.constant 17 : i32
    %2 = tpu.dynamic_rotate %1 by %c17_i32 dim 1 : vector<4x256xf32>, i32 -> vector<4x256xf32>
    %c0_1 = arith.constant 0 : index
    %c0_2 = arith.constant 0 : index
    %c0_3 = arith.constant 0 : index
    %3 = vector.load %arg6[%c0_1, %c0_2, %c0_3] : memref<9x1x256xf32, #tpu.memory_space<vmem>>, vector<1x1x256xf32>
    %4 = vector.shape_cast %3 : vector<1x1x256xf32> to vector<1x256xf32>
    %5 = vector.broadcast %4 : vector<1x256xf32> to vector<4x256xf32>
    %6 = arith.mulf %2, %5 : vector<4x256xf32>
    %c0_4 = arith.constant 0 : index
    %c0_5 = arith.constant 0 : index
    %c0_6 = arith.constant 0 : index
    %7 = vector.load %arg2[%c0_4, %c0_5, %c0_6] : memref<9x4x4xf32, #tpu.memory_space<vmem>>, vector<1x4x4xf32>
    %8 = vector.shape_cast %7 : vector<1x4x4xf32> to vector<4x4xf32>
    %cst = arith.constant dense<0.000000e+00> : vector<4x256xf32>
    %9 = tpu.matmul %8, %6, %cst {dimension_numbers = #tpu.dot_dimension_numbers<[1], [0], [0], [1], [0, 0, 1, 1], [], []>} : vector<4x4xf32>, vector<4x256xf32>, vector<4x256xf32> -> vector<4x256xf32>
    %c16_i32 = arith.constant 16 : i32
    %10 = tpu.dynamic_rotate %1 by %c16_i32 dim 1 : vector<4x256xf32>, i32 -> vector<4x256xf32>
    %c1 = arith.constant 1 : index
    %c0_7 = arith.constant 0 : index
    %c0_8 = arith.constant 0 : index
    %11 = vector.load %arg6[%c1, %c0_7, %c0_8] : memref<9x1x256xf32, #tpu.memory_space<vmem>>, vector<1x1x256xf32>
    %12 = vector.shape_cast %11 : vector<1x1x256xf32> to vector<1x256xf32>
    %13 = vector.broadcast %12 : vector<1x256xf32> to vector<4x256xf32>
    %14 = arith.mulf %10, %13 : vector<4x256xf32>
    %c1_9 = arith.constant 1 : index
    %c0_10 = arith.constant 0 : index
    %c0_11 = arith.constant 0 : index
    %15 = vector.load %arg2[%c1_9, %c0_10, %c0_11] : memref<9x4x4xf32, #tpu.memory_space<vmem>>, vector<1x4x4xf32>
    %16 = vector.shape_cast %15 : vector<1x4x4xf32> to vector<4x4xf32>
    %cst_12 = arith.constant dense<0.000000e+00> : vector<4x256xf32>
    %17 = tpu.matmul %16, %14, %cst_12 {dimension_numbers = #tpu.dot_dimension_numbers<[1], [0], [0], [1], [0, 0, 1, 1], [], []>} : vector<4x4xf32>, vector<4x256xf32>, vector<4x256xf32> -> vector<4x256xf32>
    %18 = arith.addf %9, %17 : vector<4x256xf32>
    %c15_i32 = arith.constant 15 : i32
    %19 = tpu.dynamic_rotate %1 by %c15_i32 dim 1 : vector<4x256xf32>, i32 -> vector<4x256xf32>
    %c2 = arith.constant 2 : index
    %c0_13 = arith.constant 0 : index
    %c0_14 = arith.constant 0 : index
    %20 = vector.load %arg6[%c2, %c0_13, %c0_14] : memref<9x1x256xf32, #tpu.memory_space<vmem>>, vector<1x1x256xf32>
    %21 = vector.shape_cast %20 : vector<1x1x256xf32> to vector<1x256xf32>
    %22 = vector.broadcast %21 : vector<1x256xf32> to vector<4x256xf32>
    %23 = arith.mulf %19, %22 : vector<4x256xf32>
    %c2_15 = arith.constant 2 : index
    %c0_16 = arith.constant 0 : index
    %c0_17 = arith.constant 0 : index
    %24 = vector.load %arg2[%c2_15, %c0_16, %c0_17] : memref<9x4x4xf32, #tpu.memory_space<vmem>>, vector<1x4x4xf32>
    %25 = vector.shape_cast %24 : vector<1x4x4xf32> to vector<4x4xf32>
    %cst_18 = arith.constant dense<0.000000e+00> : vector<4x256xf32>
    %26 = tpu.matmul %25, %23, %cst_18 {dimension_numbers = #tpu.dot_dimension_numbers<[1], [0], [0], [1], [0, 0, 1, 1], [], []>} : vector<4x4xf32>, vector<4x256xf32>, vector<4x256xf32> -> vector<4x256xf32>
    %27 = arith.addf %18, %26 : vector<4x256xf32>
    %c1_i32 = arith.constant 1 : i32
    %28 = tpu.dynamic_rotate %1 by %c1_i32 dim 1 : vector<4x256xf32>, i32 -> vector<4x256xf32>
    %c3 = arith.constant 3 : index
    %c0_19 = arith.constant 0 : index
    %c0_20 = arith.constant 0 : index
    %29 = vector.load %arg6[%c3, %c0_19, %c0_20] : memref<9x1x256xf32, #tpu.memory_space<vmem>>, vector<1x1x256xf32>
    %30 = vector.shape_cast %29 : vector<1x1x256xf32> to vector<1x256xf32>
    %31 = vector.broadcast %30 : vector<1x256xf32> to vector<4x256xf32>
    %32 = arith.mulf %28, %31 : vector<4x256xf32>
    %c3_21 = arith.constant 3 : index
    %c0_22 = arith.constant 0 : index
    %c0_23 = arith.constant 0 : index
    %33 = vector.load %arg2[%c3_21, %c0_22, %c0_23] : memref<9x4x4xf32, #tpu.memory_space<vmem>>, vector<1x4x4xf32>
    %34 = vector.shape_cast %33 : vector<1x4x4xf32> to vector<4x4xf32>
    %cst_24 = arith.constant dense<0.000000e+00> : vector<4x256xf32>
    %35 = tpu.matmul %34, %32, %cst_24 {dimension_numbers = #tpu.dot_dimension_numbers<[1], [0], [0], [1], [0, 0, 1, 1], [], []>} : vector<4x4xf32>, vector<4x256xf32>, vector<4x256xf32> -> vector<4x256xf32>
    %36 = arith.addf %27, %35 : vector<4x256xf32>
    %c4 = arith.constant 4 : index
    %c0_25 = arith.constant 0 : index
    %c0_26 = arith.constant 0 : index
    %37 = vector.load %arg6[%c4, %c0_25, %c0_26] : memref<9x1x256xf32, #tpu.memory_space<vmem>>, vector<1x1x256xf32>
    %38 = vector.shape_cast %37 : vector<1x1x256xf32> to vector<1x256xf32>
    %39 = vector.broadcast %38 : vector<1x256xf32> to vector<4x256xf32>
    %40 = arith.mulf %1, %39 : vector<4x256xf32>
    %c4_27 = arith.constant 4 : index
    %c0_28 = arith.constant 0 : index
    %c0_29 = arith.constant 0 : index
    %41 = vector.load %arg2[%c4_27, %c0_28, %c0_29] : memref<9x4x4xf32, #tpu.memory_space<vmem>>, vector<1x4x4xf32>
    %42 = vector.shape_cast %41 : vector<1x4x4xf32> to vector<4x4xf32>
    %cst_30 = arith.constant dense<0.000000e+00> : vector<4x256xf32>
    %43 = tpu.matmul %42, %40, %cst_30 {dimension_numbers = #tpu.dot_dimension_numbers<[1], [0], [0], [1], [0, 0, 1, 1], [], []>} : vector<4x4xf32>, vector<4x256xf32>, vector<4x256xf32> -> vector<4x256xf32>
    %44 = arith.addf %36, %43 : vector<4x256xf32>
    %c255_i32 = arith.constant 255 : i32
    %45 = tpu.dynamic_rotate %1 by %c255_i32 dim 1 : vector<4x256xf32>, i32 -> vector<4x256xf32>
    %c5 = arith.constant 5 : index
    %c0_31 = arith.constant 0 : index
    %c0_32 = arith.constant 0 : index
    %46 = vector.load %arg6[%c5, %c0_31, %c0_32] : memref<9x1x256xf32, #tpu.memory_space<vmem>>, vector<1x1x256xf32>
    %47 = vector.shape_cast %46 : vector<1x1x256xf32> to vector<1x256xf32>
    %48 = vector.broadcast %47 : vector<1x256xf32> to vector<4x256xf32>
    %49 = arith.mulf %45, %48 : vector<4x256xf32>
    %c5_33 = arith.constant 5 : index
    %c0_34 = arith.constant 0 : index
    %c0_35 = arith.constant 0 : index
    %50 = vector.load %arg2[%c5_33, %c0_34, %c0_35] : memref<9x4x4xf32, #tpu.memory_space<vmem>>, vector<1x4x4xf32>
    %51 = vector.shape_cast %50 : vector<1x4x4xf32> to vector<4x4xf32>
    %cst_36 = arith.constant dense<0.000000e+00> : vector<4x256xf32>
    %52 = tpu.matmul %51, %49, %cst_36 {dimension_numbers = #tpu.dot_dimension_numbers<[1], [0], [0], [1], [0, 0, 1, 1], [], []>} : vector<4x4xf32>, vector<4x256xf32>, vector<4x256xf32> -> vector<4x256xf32>
    %53 = arith.addf %44, %52 : vector<4x256xf32>
    %c241_i32 = arith.constant 241 : i32
    %54 = tpu.dynamic_rotate %1 by %c241_i32 dim 1 : vector<4x256xf32>, i32 -> vector<4x256xf32>
    %c6 = arith.constant 6 : index
    %c0_37 = arith.constant 0 : index
    %c0_38 = arith.constant 0 : index
    %55 = vector.load %arg6[%c6, %c0_37, %c0_38] : memref<9x1x256xf32, #tpu.memory_space<vmem>>, vector<1x1x256xf32>
    %56 = vector.shape_cast %55 : vector<1x1x256xf32> to vector<1x256xf32>
    %57 = vector.broadcast %56 : vector<1x256xf32> to vector<4x256xf32>
    %58 = arith.mulf %54, %57 : vector<4x256xf32>
    %c6_39 = arith.constant 6 : index
    %c0_40 = arith.constant 0 : index
    %c0_41 = arith.constant 0 : index
    %59 = vector.load %arg2[%c6_39, %c0_40, %c0_41] : memref<9x4x4xf32, #tpu.memory_space<vmem>>, vector<1x4x4xf32>
    %60 = vector.shape_cast %59 : vector<1x4x4xf32> to vector<4x4xf32>
    %cst_42 = arith.constant dense<0.000000e+00> : vector<4x256xf32>
    %61 = tpu.matmul %60, %58, %cst_42 {dimension_numbers = #tpu.dot_dimension_numbers<[1], [0], [0], [1], [0, 0, 1, 1], [], []>} : vector<4x4xf32>, vector<4x256xf32>, vector<4x256xf32> -> vector<4x256xf32>
    %62 = arith.addf %53, %61 : vector<4x256xf32>
    %c240_i32 = arith.constant 240 : i32
    %63 = tpu.dynamic_rotate %1 by %c240_i32 dim 1 : vector<4x256xf32>, i32 -> vector<4x256xf32>
    %c7 = arith.constant 7 : index
    %c0_43 = arith.constant 0 : index
    %c0_44 = arith.constant 0 : index
    %64 = vector.load %arg6[%c7, %c0_43, %c0_44] : memref<9x1x256xf32, #tpu.memory_space<vmem>>, vector<1x1x256xf32>
    %65 = vector.shape_cast %64 : vector<1x1x256xf32> to vector<1x256xf32>
    %66 = vector.broadcast %65 : vector<1x256xf32> to vector<4x256xf32>
    %67 = arith.mulf %63, %66 : vector<4x256xf32>
    %c7_45 = arith.constant 7 : index
    %c0_46 = arith.constant 0 : index
    %c0_47 = arith.constant 0 : index
    %68 = vector.load %arg2[%c7_45, %c0_46, %c0_47] : memref<9x4x4xf32, #tpu.memory_space<vmem>>, vector<1x4x4xf32>
    %69 = vector.shape_cast %68 : vector<1x4x4xf32> to vector<4x4xf32>
    %cst_48 = arith.constant dense<0.000000e+00> : vector<4x256xf32>
    %70 = tpu.matmul %69, %67, %cst_48 {dimension_numbers = #tpu.dot_dimension_numbers<[1], [0], [0], [1], [0, 0, 1, 1], [], []>} : vector<4x4xf32>, vector<4x256xf32>, vector<4x256xf32> -> vector<4x256xf32>
    %71 = arith.addf %62, %70 : vector<4x256xf32>
    %c239_i32 = arith.constant 239 : i32
    %72 = tpu.dynamic_rotate %1 by %c239_i32 dim 1 : vector<4x256xf32>, i32 -> vector<4x256xf32>
    %c8 = arith.constant 8 : index
    %c0_49 = arith.constant 0 : index
    %c0_50 = arith.constant 0 : index
    %73 = vector.load %arg6[%c8, %c0_49, %c0_50] : memref<9x1x256xf32, #tpu.memory_space<vmem>>, vector<1x1x256xf32>
    %74 = vector.shape_cast %73 : vector<1x1x256xf32> to vector<1x256xf32>
    %75 = vector.broadcast %74 : vector<1x256xf32> to vector<4x256xf32>
    %76 = arith.mulf %72, %75 : vector<4x256xf32>
    %c8_51 = arith.constant 8 : index
    %c0_52 = arith.constant 0 : index
    %c0_53 = arith.constant 0 : index
    %77 = vector.load %arg2[%c8_51, %c0_52, %c0_53] : memref<9x4x4xf32, #tpu.memory_space<vmem>>, vector<1x4x4xf32>
    %78 = vector.shape_cast %77 : vector<1x4x4xf32> to vector<4x4xf32>
    %cst_54 = arith.constant dense<0.000000e+00> : vector<4x256xf32>
    %79 = tpu.matmul %78, %76, %cst_54 {dimension_numbers = #tpu.dot_dimension_numbers<[1], [0], [0], [1], [0, 0, 1, 1], [], []>} : vector<4x4xf32>, vector<4x256xf32>, vector<4x256xf32> -> vector<4x256xf32>
    %80 = arith.addf %71, %79 : vector<4x256xf32>
    %c0_55 = arith.constant 0 : index
    %c0_56 = arith.constant 0 : index
    %81 = vector.load %arg3[%c0_55, %c0_56] : memref<4x1xf32, #tpu.memory_space<vmem>>, vector<4x1xf32>
    %82 = vector.broadcast %81 : vector<4x1xf32> to vector<4x256xf32>
    %83 = arith.addf %80, %82 : vector<4x256xf32>
    %cst_57 = arith.constant 0.000000e+00 : f32
    %84 = vector.broadcast %cst_57 : f32 to vector<4x256xf32>
    %85 = arith.maximumf %83, %84 : vector<4x256xf32>
    %c0_58 = arith.constant 0 : index
    %c0_59 = arith.constant 0 : index
    %86 = vector.load %arg4[%c0_58, %c0_59] : memref<1x4xf32, #tpu.memory_space<vmem>>, vector<1x4xf32>
    %cst_60 = arith.constant dense<0.000000e+00> : vector<1x256xf32>
    %87 = tpu.matmul %86, %85, %cst_60 {dimension_numbers = #tpu.dot_dimension_numbers<[1], [0], [0], [1], [0, 0, 1, 1], [], []>} : vector<1x4xf32>, vector<4x256xf32>, vector<1x256xf32> -> vector<1x256xf32>
    %c0_61 = arith.constant 0 : index
    %c0_62 = arith.constant 0 : index
    %88 = vector.load %arg5[%c0_61, %c0_62] : memref<1x1xf32, #tpu.memory_space<vmem>>, vector<1x1xf32>
    %89 = vector.broadcast %88 : vector<1x1xf32> to vector<1x256xf32>
    %90 = arith.addf %87, %89 : vector<1x256xf32>
    %91 = arith.negf %90 : vector<1x256xf32>
    %92 = math.exp %91 : vector<1x256xf32>
    %cst_63 = arith.constant 1.000000e+00 : f32
    %93 = vector.broadcast %cst_63 : f32 to vector<1x256xf32>
    %94 = arith.addf %93, %92 : vector<1x256xf32>
    %95 = arith.divf %93, %94 : vector<1x256xf32>
    %96 = arith.truncf %95 : vector<1x256xf32> to vector<1x256xbf16>
    %c0_64 = arith.constant 0 : index
    %c0_65 = arith.constant 0 : index
    %97 = vector.load %arg7[%c0_64, %c0_65] : memref<1x256xbf16, #tpu.memory_space<vmem>>, vector<1x256xbf16>
    tpu.vector_store %arg7[%c0_64, %c0_65], %96 {strides = array<i32>} : memref<1x256xbf16, #tpu.memory_space<vmem>>, vector<1x256xbf16>,
    return
  }
  func.func @transform_0(%arg0: i32) -> (i32, i32) {
    %c0_i32 = arith.constant 0 : i32
    %c0_i32_0 = arith.constant 0 : i32
    return %c0_i32, %arg0 : i32, i32
  }
  func.func @transform_1(%arg0: i32) -> (i32, i32, i32) {
    %c0_i32 = arith.constant 0 : i32
    %c0_i32_0 = arith.constant 0 : i32
    %c0_i32_1 = arith.constant 0 : i32
    %c0_i32_2 = arith.constant 0 : i32
    return %c0_i32, %c0_i32_0, %c0_i32_1 : i32, i32, i32
  }
  func.func @transform_2(%arg0: i32) -> (i32, i32) {
    %c0_i32 = arith.constant 0 : i32
    %c0_i32_0 = arith.constant 0 : i32
    %c0_i32_1 = arith.constant 0 : i32
    return %c0_i32, %c0_i32_0 : i32, i32
  }
  func.func @transform_3(%arg0: i32) -> (i32, i32) {
    %c0_i32 = arith.constant 0 : i32
    %c0_i32_0 = arith.constant 0 : i32
    %c0_i32_1 = arith.constant 0 : i32
    return %c0_i32, %c0_i32_0 : i32, i32
  }
  func.func @transform_4(%arg0: i32) -> (i32, i32) {
    %c0_i32 = arith.constant 0 : i32
    %c0_i32_0 = arith.constant 0 : i32
    %c0_i32_1 = arith.constant 0 : i32
    return %c0_i32, %c0_i32_0 : i32, i32
  }
  func.func @transform_5(%arg0: i32) -> (i32, i32, i32) {
    %c0_i32 = arith.constant 0 : i32
    %c0_i32_0 = arith.constant 0 : i32
    %c0_i32_1 = arith.constant 0 : i32
    %c0_i32_2 = arith.constant 0 : i32
    return %c0_i32, %c0_i32_0, %c0_i32_1 : i32, i32, i32
  }
  func.func @transform_6(%arg0: i32) -> (i32, i32) {
    %c0_i32 = arith.constant 0 : i32
    %c0_i32_0 = arith.constant 0 : i32
    return %c0_i32, %arg0 : i32, i32
  }
}

</mosaic_0001>

<bundles_post_ra>
// kernel: tpu_custom_call.1
= control target key start
LH: loop header
LB: loop body
LE: loop exit
PB: predicated region body
PF: predicated region fallthrough
CT: control target
= control target key end

     0   :  { %s1982_s0 = inlined_call_operand.vmem [shape: bf16[4,512], index: 0, kind: input, shape index: {}]   ;;  %s1983_s1 = inlined_call_operand.vmem [shape: f32[9,4,4], index: 1, kind: input, shape index: {}]   ;;  %s1984_s2 = inlined_call_operand.vmem [shape: f32[4,1], index: 2, kind: input, shape index: {}]   ;;  %s1985_s3 = inlined_call_operand.vmem [shape: f32[1,4], index: 3, kind: input, shape index: {}]   ;;  %s1986_s4 = inlined_call_operand.<no memory space> [shape: f32[1,1], index: 4, kind: input, shape index: {}]   ;;  %s1987_s5 = inlined_call_operand.vmem [shape: f32[9,1,256], index: 5, kind: input, shape index: {}]   ;;  %s1988_s6 = inlined_call_operand.hbm [shape: bf16[1,512], index: 6, kind: output, shape index: {}]  }
   0x1   :  { %v11_v0 = vstv %s1986_s4 }
   0x2   :  { %12 = vst [vmem:[#allocation2] sm:$0x1] %v11_v0 }
   0x3   :  { %13 = vsyncpa [#allocation4], 0 }
   0x4   :  { %15 = vsyncpa [#allocation4 + $0x1], 0  ;;  %s1713_s23 = smov 0   ;;  %s1715_s24 = smov 0  }
   0x5   :  { %s1717_s25 = smov 0   ;;  %s1719_s26 = smov 0  }
   0x6 LB: > { %s1734_s4 = sadd.s32 4294967295, %s1661_s26   ;;  %s1421_s27 = sadd.s32 4294967294, %s1661_s26   ;;  %s1661_s26 = sphi %s1719_s26, %s1994_s26   ;;  %s1657_s25 = sphi %s1717_s25, %s1993_s25   ;;  %s1653_s24 = sphi %s1715_s24, %s1992_s24   ;;  %s1649_s23 = sphi %s1713_s23, %s1991_s23  }
   0x7   : > { %s1738_s28 = sadd.s32 1, %s1661_s26   ;;  %s159_s29 = sadd.s32 1, %s1657_s25 }
   0x8   : > { %s156_s30 = ssub.s32 %s1661_s26, %s1738_s28  ;;  %p169_p0 = scmp.ne.s32.totalorder %s1657_s25, %s1653_s24 }
   0x9   : > { %p157_p1 = scmp.eq.s32.totalorder %s156_s30, 0  ;;  %p170_p2 = scmp.eq.s32.totalorder %s1734_s4, 1 }
   0xa   : > { %p175_p3 = scmp.ne.s32.totalorder %s1653_s24, %s1649_s23  ;;  %p176_p4 = scmp.eq.s32.totalorder %s1421_s27, 1 }
   0xb   : > { %s1749_s7 = scalar_select %p157_p1, %s1657_s25, %s159_s29  }
   0xc   : > { %p1751_p5 = por %p170_p2, %p169_p0  ;;  %p1755_p6 = por %p176_p4, %p175_p3 }
   0xd   : > { %p1424_p7 = scmp.ge.s32.totalorder %s1661_s26, 1  ;;  %p218_p8 = scmp.lt.s32.totalorder %s1661_s26, 3 }
   0xf   : > { %p219_p9 = pnand %p1424_p7, %p218_p8 }
  0x10   : > { %s1426_s10 = sshll.u32 (!%p219_p9), %s1734_s4, 1  ;;  %v264_v1 = vlaneseq (!%p219_p9)  ;;  %v1663_v3 = vmov (!%p219_p9), 0.0   ;;  %v1446_v4 = vld [vmem:[%s1987_s5 + $0x8] sm:$0x3] (!%p219_p9)  ;;  %vm312_vm0 = vcmask (!%p219_p9), 1043456   ;;  %s1664_s17 = smov (!%p219_p9), 16  }
  0x11   : > { %222 = sbr.rel (%p219_p9) target bundleno = 667 (0x29b), region = 44  ;;  %p249_p10 = scmp.lt.s32.totalorder (!%p219_p9), %s1426_s10, 3  ;;  %771 = vmatprep.mubr.f32.mxu0 (!%p219_p9), %v1663_v3  ;;  %383 = vmatprep.mubr.f32.mxu1 (!%p219_p9), %v1663_v3  ;;  %vm308_vm1 = vcmask (!%p219_p9), 31744   ;;  %v1447_v16 = vld [vmem:[%s1983_s1 + $0x10] sm:$0xf] (!%p219_p9)  ;;  %v1672_v18 = vmov (!%p219_p9), 0  }
  0x12   : > { %v1762_v2 = vshrl.u32 (!%p219_p9), %v264_v1, 7  ;;  %s1665_s18 = smov (!%p219_p9), 17   ;;  %s1666_s21 = smov (!%p219_p9), 127   ;;  %v1204_v17 = vld [vmem:[%s1984_s2] sm:$0xf] (!%p219_p9)  ;;  %1589 = vset.pattern.permute.xlu0 (!%p219_p9), %v1672_v18  ;;  %1590 = vset.pattern.permute.xlu1 (!%p219_p9), %v1672_v18  ;;  %v1790_v19 = vand.u32 (!%p219_p9), 127, %v264_v1 }
  0x13   : > { %s1667_s22 = smov (!%p219_p9), 113   ;;  %s1668_s27 = smov (!%p219_p9), 15   ;;  %v1451_v20 = vld [vmem:[%s1987_s5 + $0xa] sm:$0x3] (!%p219_p9)  ;;  %v1428_v21 = vld [vmem:[%s1987_s5 + $0x2] sm:$0x3] (!%p219_p9) }
  0x14   : > { %v1770_v5 = vsub.s32 (!%p219_p9), 0, %v1762_v2  ;;  %v1773_v6 = vsub.s32 (!%p219_p9), 1, %v1762_v2  ;;  %s1669_s29 = smov (!%p219_p9), 112   ;;  %s1670_s30 = smov (!%p219_p9), 1   ;;  %v269_v22 = vld [vmem:[%s1987_s5] sm:$0x3] (!%p219_p9) }
  0x15   : > { %vm784_vm2 = vcmp.lt.s32.totalorder (!%p219_p9), %v1790_v19, 127  ;;  %vm288_vm3 = vcmp.lt.s32.totalorder (!%p219_p9), %v1790_v19, 16  ;;  %v1456_v26 = vld [vmem:[%s1987_s5 + $0xc] sm:$0x3] (!%p219_p9)  ;;  %vm266_vm4 = vcmp.lt.s32.totalorder (!%p219_p9), %v1790_v19, 17  ;;  %vm890_vm5 = vcmp.lt.s32.totalorder (!%p219_p9), %v1790_v19, 113 }
  0x16   : > { %v688_v7 = vrot.slane (!%p219_p9), %v1446_v4, %v1770_v5  ;;  %v692_v8 = vrot.slane (!%p219_p9), %v1446_v4, %v1773_v6  ;;  %v793_v23 = vrot.slane (!%p219_p9), %v1451_v20, %v1770_v5  ;;  %v797_v24 = vrot.slane (!%p219_p9), %v1451_v20, %v1773_v6  ;;  %v1436_v36 = vld [vmem:[%s1987_s5 + $0x4] sm:$0x3] (!%p219_p9)  ;;  %v1827_v43 = vld [vmem:[%s1987_s5 + $0xe] sm:$0x3] (!%p219_p9)  ;;  %s245_s15 = sand.u32 (!%p219_p9), 1, %s1653_s24  }
  0x17   : > { %v297_v25 = vrot.slane (!%p219_p9), %v1428_v21, %v1770_v5  ;;  %v301_v28 = vrot.slane (!%p219_p9), %v1428_v21, %v1773_v6  ;;  %v274_v29 = vrot.slane (!%p219_p9), %v269_v22, %v1770_v5  ;;  %v278_v30 = vrot.slane (!%p219_p9), %v269_v22, %v1773_v6  ;;  %v1429_v52 = vld [vmem:[%s1983_s1 + $0x4] sm:$0xf] (!%p219_p9) }
  0x18   : > { %s1996_s10 = smov (!%p249_p10, %s1426_s10), 3  ;;  %v693_v11 = vcombine.low %v688_v7, %v692_v8  ;;  %v899_v37 = vrot.slane %v1456_v26, %v1770_v5  ;;  %v903_v38 = vrot.slane %v1456_v26, %v1773_v6  ;;  %vm474_vm6 = vcmp.lt.s32.totalorder %v1790_v19, 15  ;;  %v1441_v8 = vld [vmem:[%s1987_s5 + $0x6] sm:$0x3]  ;;  %v283_v26 = vld [vmem:[%s1983_s1] sm:$0xf] }
  0x19   : > { %s1427_s13 = sshll.u32 %s1996_s10, 1  ;;  %s1671_s10 = smov 111   ;;  %v483_v49 = vrot.slane %v1436_v36, %v1770_v5  ;;  %v487_v56 = vrot.slane %v1436_v36, %v1773_v6  ;;  %vm996_vm7 = vcmp.lt.s32.totalorder %v1790_v19, 112  ;;  %v1009_v57 = vrot.slane %v1827_v43, %v1773_v6  ;;  %v1457_v36 = vld [vmem:[%s1983_s1 + $0x18] sm:$0xf] }
  0x1a   : > { %s252_s16 = scalar_lea.vmem %s1982_s0, %s1427_s13  ;;  %vm580_vm8 = vcmp.lt.s32.totalorder %v1790_v19, 1  ;;  %v593_v20 = vrot.slane %v1441_v8, %v1773_v6  ;;  %vm1102_vm9 = vcmp.lt.s32.totalorder %v1790_v19, 111  ;;  %v1442_v19 = vld [vmem:[%s1983_s1 + $0xc] sm:$0xf]  ;;  %vm1337_vm10 = vcmask 1040384  }
  0x1b   : > { %v255_v9 = vld [vmem:[%s252_s16] sm:$0xf]  ;;  %s1425_s16 = sshll.u32 %s245_s15, 1  ;;  %vm1338_vm11 = vsmask.f32 256  ;;  %vm1340_vm12 = vcmask 1041409  }
  0x1c   : > { %v256_v10 = vunpack.c.l.bf16 %v255_v9  ;;  %v1452_v9 = vld [vmem:[%s1983_s1 + $0x14] sm:$0xf]  ;;  %vm1341_vm13 = vsmask.f32 1280  ;;  %vm1339_vm14 = vmand %vm1337_vm10, %vm1338_vm11 }
  0x1d   : > { %vm1342_vm15 = vmand %vm1340_vm12, %vm1341_vm13 }
  0x1e   : > { %v258_v12 = vcombine.high %v256_v10, %v256_v10  ;;  %v695_v13 = vmul.f32 %v693_v11, %v256_v10 }
  0x20   : > { %v1549_v14 = vpack.i.bf16 %v258_v12, %v256_v10  ;;  %v699_v15 = vcombine.high %v695_v13, %v695_v13 }
  0x22   : > { %1550 = vrot.lane.b32.xlu0 %v1549_v14, %s1664_s17  ;;  %1560 = vrot.lane.b32.xlu1 %v1549_v14, %s1665_s18  ;;  %s1482_s17 = sshll.u32 %s1734_s4, 5  ;;  %s247_s18 = scalar_lea.vmem [#allocation3], %s1425_s16 }
  0x23   : > { %1448 = vmatprep.subr.msk.mxu0 %vm312_vm0, %v699_v15  ;;  %v1005_v15 = vrot.slane %v1827_v43, %v1770_v5  ;;  %s1362_s19 = sshll.u32 %s247_s18, 4  ;;  %s1674_s4 = smov [#allocation3]   ;;  %s1942_s19 = int_to_ptr.vmem [resolvable:$true] %s1362_s19 }
  0x24   : > { %1449 = vmatpush1.msk.msra.mxu0 %vm312_vm0, %v695_v13 }
  0x25   : > { %1450 = vmatmul.mubr.msk.f32.vlgmr.msra.gmra.mrb[0].mxu0 %vm308_vm1, %v1447_v16 }
  0x26   : > { %1555 = vrot.lane.b32.xlu0 %v1549_v14, %s1666_s21  ;;  %1565 = vrot.lane.b32.xlu1 %v1549_v14, %s1667_s22  ;;  %s1940_s22 = scalar_lea.hbm %s1988_s6, %s1482_s17 }
  0x27   : > { %877 = vmatprep.mubr.f32.mxu0 %v1663_v3 }
  0x2a   : > { %1570 = vrot.lane.b32.xlu0 %v1549_v14, %s1668_s27  ;;  %1575 = vrot.lane.b32.xlu1 %v1549_v14, %s1669_s29  ;;  %s1348_s27 = scalar_lea.sflag [#allocation4], %s245_s15  ;;  %s1599_s29 = scalar_lea.vmem %s1942_s19, 32 }
  0x2b   : > { %p1600_p11 = scmp.ne.s32.totalorder %s1942_s19, %s1599_s29 }
  0x2d   : > { %p1601_p12 = pnand %p1600_p11, %p1751_p5 }
  0x2e   : > { %1580 = vrot.lane.b32.xlu0 %v1549_v14, %s1670_s30  ;;  %1585 = vrot.lane.b32.xlu1 %v1549_v14, %s1671_s10  ;;  %v1466_v14 = vld [vmem:[%s1987_s5 + $0x10] sm:$0x3]  ;;  %s1603_s30 = sshll.u32 %s1674_s4, 4  ;;  %s1604_s30 = int_to_ptr.vmem [resolvable:$false] %s1603_s30 }
  0x2f   : > { %p1602_p13 = pneg %p1601_p12  ;;  %s1605_s10 = scalar_lea.vmem %s1604_s30, 64 }
  0x30   : > { %p1606_p0 = scmp.lt.s32.totalorder %s1942_s19, %s1604_s30  ;;  %p1607_p1 = scmp.lt.s32.totalorder %s1605_s10, %s1599_s29 }
  0x32   : > { %1207 = vperm.xlu0 %1589, %v1204_v17   ;;  %p1608_p2 = por %p1607_p1, %p1606_p0 }
  0x34   : > { %p1609_p3 = pnand %p1608_p2, %p1602_p13 }
  0x94   : > { %v1551_v27 = vpop.permute.xlu0 %1550  ;;  %v1561_v31 = vpop.permute.xlu1 %1560 }
  0x95   : > { %v1553_v32 = vunpack.i.h.bf16 %v1551_v27  ;;  %v1552_v33 = vunpack.i.l.bf16 %v1551_v27  ;;  %v1563_v34 = vunpack.i.h.bf16 %v1561_v31  ;;  %v1562_v35 = vunpack.i.l.bf16 %v1561_v31 }
  0x97   : > { %v289_v39 = vsel %vm288_vm3, %v1552_v33, %v1553_v32  ;;  %v267_v40 = vsel %vm266_vm4, %v1562_v35, %v1563_v34  ;;  %v268_v41 = vsel %vm266_vm4, %v1563_v34, %v1562_v35  ;;  %v290_v42 = vsel %vm288_vm3, %v1553_v32, %v1552_v33 }
  0x98   : > { %v1556_v44 = vpop.permute.xlu0 %1555  ;;  %v305_v45 = vmul.f32 %v301_v28, %v289_v39  ;;  %v282_v46 = vmul.f32 %v278_v30, %v267_v40  ;;  %v304_v47 = vmul.f32 %v297_v25, %v290_v42  ;;  %v1566_v48 = vpop.permute.xlu1 %1565  ;;  %v281_v55 = vmul.f32 %v274_v29, %v268_v41  ;;  %v1437_v41 = vld [vmem:[%s1983_s1 + $0x8] sm:$0xf] }
  0x99   : > { %v1558_v50 = vunpack.i.h.bf16 %v1556_v44  ;;  %v1557_v51 = vunpack.i.l.bf16 %v1556_v44  ;;  %v1568_v53 = vunpack.i.h.bf16 %v1566_v48  ;;  %v1567_v54 = vunpack.i.l.bf16 %v1566_v48 }
  0x9a   : > { %1430 = vmatprep.subr.msk.mxu1 %vm312_vm0, %v305_v45  ;;  %v1111_v42 = vrot.slane %v1466_v14, %v1770_v5  ;;  %v1462_v45 = vld [vmem:[%s1983_s1 + $0x1c] sm:$0xf] }
  0x9b   : > { %v785_v58 = vsel %vm784_vm2, %v1557_v51, %v1558_v50  ;;  %v786_v59 = vsel %vm784_vm2, %v1558_v50, %v1557_v51  ;;  %1431 = vmatpush1.msk.msra.mxu1 %vm312_vm0, %v304_v47  ;;  %v891_v60 = vsel %vm890_vm5, %v1567_v54, %v1568_v53  ;;  %v892_v61 = vsel %vm890_vm5, %v1568_v53, %v1567_v54  ;;  %v1215_v47 = vld [vmem:[#allocation2] sm:$0x1] }
  0x9c   : > { %v800_v62 = vmul.f32 %v793_v23, %v785_v58  ;;  %v801_v63 = vmul.f32 %v797_v24, %v786_v59  ;;  %1432 = vmatmul.mubr.msk.f32.vlgmr.msra.gmra.mrb[0].mxu1 %vm308_vm1, %v1429_v52  ;;  %v906_v0 = vmul.f32 %v899_v37, %v891_v60  ;;  %v907_v1 = vmul.f32 %v903_v38, %v892_v61  ;;  %v1571_v4 = vpop.permute.xlu0 %1570  ;;  %v1576_v7 = vpop.permute.xlu1 %1575  ;;  %v1214_v59 = vld [vmem:[%s1985_s3] sm:$0x1] }
  0x9d   : > { %1433 = vmatprep.subr.msk.mxu1 %vm312_vm0, %v282_v46  ;;  %463 = vmatprep.mubr.f32.mxu1 %v1663_v3  ;;  %v1573_v10 = vunpack.i.h.bf16 %v1571_v4  ;;  %v1572_v11 = vunpack.i.l.bf16 %v1571_v4  ;;  %v1578_v12 = vunpack.i.h.bf16 %v1576_v7  ;;  %v1577_v13 = vunpack.i.l.bf16 %v1576_v7  ;;  %v1467_v46 = vld [vmem:[%s1983_s1 + $0x20] sm:$0xf] }
  0x9e   : > { %1453 = vmatprep.subr.msk.mxu0 %vm312_vm0, %v801_v63  ;;  %1434 = vmatpush1.msk.msra.mxu1 %vm312_vm0, %v281_v55  ;;  %v1115_v24 = vrot.slane %v1466_v14, %v1773_v6  ;;  %v589_v37 = vrot.slane %v1441_v8, %v1770_v5 }
  0x9f   : > { %1454 = vmatpush1.msk.msra.mxu0 %vm312_vm0, %v800_v62  ;;  %v475_v16 = vsel %vm474_vm6, %v1572_v11, %v1573_v10  ;;  %v476_v17 = vsel %vm474_vm6, %v1573_v10, %v1572_v11  ;;  %v998_v18 = vsel %vm996_vm7, %v1578_v12, %v1577_v13  ;;  %v997_v31 = vsel %vm996_vm7, %v1577_v13, %v1578_v12 }
  0xa0   : > { %1455 = vmatmul.mubr.msk.f32.vlgmr.msra.gmra.mrb[0].mxu0 %vm308_vm1, %v1452_v9  ;;  %v490_v21 = vmul.f32 %v483_v49, %v476_v17  ;;  %v491_v22 = vmul.f32 %v487_v56, %v475_v16  ;;  %1458 = vmatprep.subr.msk.mxu0 %vm312_vm0, %v907_v1  ;;  %v1581_v23 = vpop.permute.xlu0 %1580  ;;  %v1586_v25 = vpop.permute.xlu1 %1585  ;;  %v1013_v27 = vmul.f32 %v1009_v57, %v998_v18  ;;  %v1673_v11 = vmov 1966171168   ;;  %v1344_v18 = vld [vmem:[%s247_s18] sm:$0x3] }
  0xa1   : > { %1459 = vmatpush1.msk.msra.mxu0 %vm312_vm0, %v906_v0  ;;  %983 = vmatprep.mubr.f32.mxu0 %v1663_v3  ;;  %v1583_v28 = vunpack.i.h.bf16 %v1581_v23  ;;  %v1582_v29 = vunpack.i.l.bf16 %v1581_v23  ;;  %v1588_v30 = vunpack.i.h.bf16 %v1586_v25  ;;  %v1587_v32 = vunpack.i.l.bf16 %v1586_v25 }
  0xa2   : > { %1438 = vmatprep.subr.msk.mxu1 %vm312_vm0, %v491_v22  ;;  %1463 = vmatprep.subr.msk.mxu0 %vm312_vm0, %v1013_v27  ;;  %v1012_v35 = vmul.f32 %v1005_v15, %v997_v31  ;;  %v1323_v12 = vunpack.c.l.s4 %v1673_v11 }
  0xa3   : > { %v581_v6 = vsel %vm580_vm8, %v1582_v29, %v1583_v28  ;;  %v1104_v34 = vsel %vm1102_vm9, %v1588_v30, %v1587_v32  ;;  %v582_v39 = vsel %vm580_vm8, %v1583_v28, %v1582_v29  ;;  %v1103_v43 = vsel %vm1102_vm9, %v1587_v32, %v1588_v30  ;;  %1218 = vperm.xlu1 %1590, %v1215_v47  }
  0xa4   : > { %1435 = vmatmul.mubr.msk.f32.vlgmr.msra.gmra.mrb[0].mxu1 %vm308_vm1, %v283_v26  ;;  %v597_v33 = vmul.f32 %v593_v20, %v581_v6  ;;  %v1119_v38 = vmul.f32 %v1115_v24, %v1104_v34  ;;  %v596_v40 = vmul.f32 %v589_v37, %v582_v39  ;;  %v1118_v44 = vmul.f32 %v1111_v42, %v1103_v43 }
  0xa5   : > { %1439 = vmatpush1.msk.msra.mxu1 %vm312_vm0, %v490_v21  ;;  %567 = vmatprep.mubr.f32.mxu1 %v1663_v3 }
  0xa6   : > { %1443 = vmatprep.subr.msk.mxu1 %vm312_vm0, %v597_v33 }
  0xa8   : > { %1460 = vmatmul.mubr.msk.f32.vlgmr.msra.gmra.mrb[0].mxu0 %vm308_vm1, %v1457_v36 }
  0xa9   : > { %1464 = vmatpush1.msk.msra.mxu0 %vm312_vm0, %v1012_v35  ;;  %1089 = vmatprep.mubr.f32.mxu0 %v1663_v3 }
  0xaa   : > { %1468 = vmatprep.subr.msk.mxu0 %vm312_vm0, %v1119_v38 }
  0xac   : > { %1440 = vmatmul.mubr.msk.f32.vlgmr.msra.gmra.mrb[0].mxu1 %vm308_vm1, %v1437_v41 }
  0xad   : > { %1444 = vmatpush1.msk.msra.mxu1 %vm312_vm0, %v596_v40  ;;  %673 = vmatprep.mubr.f32.mxu1 %v1663_v3 }
  0xb0   : > { %1465 = vmatmul.mubr.msk.f32.vlgmr.msra.gmra.mrb[0].mxu0 %vm308_vm1, %v1462_v45 }
  0xb1   : > { %1469 = vmatpush1.msk.msra.mxu0 %vm312_vm0, %v1118_v44  ;;  %1195 = vmatprep.mubr.f32.mxu0 %v1663_v3  ;;  %v1208_v51 = vpop.permute.xlu0 %1207 }
  0xb4   : > { %1445 = vmatmul.mubr.msk.f32.vlgmr.msra.gmra.mrb[0].mxu1 %vm308_vm1, %v1442_v19 }
  0xb5   : > { %1298 = vmatprep.mubr.f32.mxu1 %v1663_v3 }
  0xb8   : > { %1470 = vmatmul.mubr.msk.f32.vlgmr.msra.gmra.mrb[0].mxu0 %vm308_vm1, %v1467_v46 }
 0x122   : > { %v1219_v3 = vpop.permute.xlu1 %1218 }
 0x123   : > { %v1224_v60 = vrot.slane %v1219_v3, %v1770_v5  ;;  %v1324_v5 = vunpack.c.0.s8 %v1323_v12 }
 0x125   : > { %v1327_v14 = vsub.s32 %v1324_v5, %v1762_v2 }
 0x187   : > { %v675_v48 = vpop.f32.mrb[0].mxu1 }
 0x188   : > { %v677_v49 = vpop.f32.mrb[1].mxu1 }
 0x18b   : > { %v1197_v50 = vpop.f32.mrb[0].mxu0 }
 0x18c   : > { %v1483_v52 = vadd.f32 %v1197_v50, %v675_v48  ;;  %v1199_v53 = vpop.f32.mrb[1].mxu0 }
 0x18d   : > { %v1484_v54 = vadd.f32 %v1199_v53, %v677_v49 }
 0x18e   : > { %v1210_v55 = vadd.f32 %v1483_v52, %v1208_v51 }
 0x18f   : > { %v1211_v56 = vadd.f32 %v1484_v54, %v1208_v51 }
 0x190   : > { %v1212_v58 = vmax.f32 %v1210_v55, 0.0 }
 0x191   : > { %v1213_v57 = vmax.f32 %v1211_v56, 0.0 }
 0x193   : > { %1471 = vmatprep.subr.msk.mxu1 %vm312_vm0, %v1213_v57 }
 0x194   : > { %1472 = vmatpush1.msk.msra.mxu1 %vm312_vm0, %v1212_v58  ;;  %vm1343_vm0 = vmor %vm1342_vm15, %vm1339_vm14 }
 0x195   : > { %1473 = vmatmul.mubr.msk.f32.vlgmr.msra.gmra.mrb[2].mxu1 %vm308_vm1, %v1214_v59 }
 0x268   : > { %v1300_v61 = vpop.f32.mrb[2].mxu1 }
 0x269   : > { %v1301_v62 = vadd.f32 %v1300_v61, %v1224_v60  ;;  %v1302_v63 = vpop.f32.mrb[3].mxu1 }
 0x26a   : > { %v1303_v0 = vadd.f32 %v1302_v63, %v1224_v60 }
 0x26b   : > { %v1474_v1 = vmul.f32 -1.442695, %v1301_v62 }
 0x26c   : > { %v1475_v4 = vmul.f32 -1.442695, %v1303_v0 }
 0x26d   : > { %1591 = vpow2.f32 %v1474_v1 }
 0x26e   : > { %1593 = vpow2.f32 %v1475_v4 }
 0x277   : > { %v1592_v7 = vpop.eup %1591 }
 0x278   : > { %v1594_v8 = vpop.eup %1593  ;;  %v1311_v9 = vadd.f32 1.0, %v1592_v7 }
 0x279   : > { %v1312_v10 = vadd.f32 1.0, %v1594_v8 }
 0x27a   : > { %1595 = vrcp.f32 %v1311_v9 }
 0x27b   : > { %1597 = vrcp.f32 %v1312_v10 }
 0x284   : > { %v1596_v13 = vpop.eup %1595 }
 0x285   : > { %v1598_v15 = vpop.eup %1597 }
 0x286   : > { %v1476_v16 = vpack.c.bf16 %v1598_v15, %v1596_v13 }
 0x288   : > { %v1328_v17 = vrot.slane %v1476_v16, %v1327_v14 }
 0x28a   : > { %v1335_v20 = vrot.slane %v1328_v17, %v1327_v14 }
 0x28c   : > { %v1345_v2 = vsel %vm1343_vm0, %v1335_v20, %v1344_v18 }
 0x28d   : > { %1346 = vst [vmem:[%s247_s18] sm:$0x3] %v1345_v2 }
 0x28e   : > { %1612 = shalt.err (!%p1609_p3)
}
 0x28f   : > { %s1613_s11 = scalar_lea.hbm %s1940_s22, 32  ;;  %s1617_s14 = scalar_lea.hbm %s1988_s6, 64 }
 0x290   : > { %p1614_p4 = scmp.ne.s32.totalorder %s1940_s22, %s1613_s11  ;;  %p1618_p9 = scmp.lt.u32.totalorder %s1940_s22, %s1988_s6 }
 0x291   : > { %p1619_p10 = scmp.lt.u32.totalorder %s1617_s14, %s1613_s11  ;;  %p1621_p12 = scmp.lt.u32.totalorder %s1613_s11, %s1940_s22 }
 0x292   : > { %p1615_p7 = pnand %p1614_p4, %p1751_p5 }
 0x293   : > { %p1620_p11 = por %p1619_p10, %p1618_p9 }
 0x294   : > { %p1616_p8 = pneg %p1615_p7 }
 0x295   : > { %p1622_p13 = por %p1621_p12, %p1620_p11 }
 0x297   : > { %p1623_p0 = pnand %p1622_p13, %p1616_p8 }
 0x299   : > { %1626 = shalt.err (!%p1623_p0)
}
 0x29a   : > { %1499 = dma.vmem_to_hbm [thread:$0]  (%p1751_p5), %s1942_s19, 32, %s1940_s22, %s1348_s27  }
 0x29b PF: > { %p1505_p1 = scmp.ge.s32.totalorder %s1661_s26, 2  ;;  %s1374_s17 = sand.u32 1, %s1649_s23  }
 0x29c   : > { %s1375_s18 = scalar_lea.sflag [#allocation4], %s1374_s17 }
 0x29d   : > { %p1502_p2 = pnand %p1505_p1, %p1755_p6 }
 0x29f   : > { %1644 = dma.done.wait (!%p1502_p2), %s1375_s18, 32  }
 0x2a0   : > { %1646 = vsyncadd (!%p1502_p2), %s1375_s18, 4294967264  ;;  %p18_p3 = scmp.ge.s32.totalorder %s1738_s28, 4   ;;  %s1991_s23 = smov %s1653_s24 }
 0x2a1   : > { %s1992_s24 = smov %s1657_s25  ;;  %s1993_s25 = smov %s1749_s7 }
 0x2a2   : > { %s1994_s26 = smov %s1738_s28  ;;  %20 = sbr.rel (!%p18_p3) target bundleno = 6 (0x6), region = 95 }
 0x2a9   :  { %1380 = vsyncpa [#allocation4], 1 }
 0x2aa   :  { %1382 = vsyncpa [#allocation4 + $0x1], 1 }

</bundles_post_ra>
